<compile_context>
chip_gen: v7x
topology: tpu7x:2x2x1
jax: 0.10.0
libtpu: 0.0.40
codegen_flags: <defaults>
</compile_context>

<pallas_src>
import math

import jax
import jax.numpy as jnp
import numpy as np
from jax.experimental import pallas as pl
from jax.experimental.pallas import tpu as pltpu


def _round_up(x, m):
    return ((x + m - 1) // m) * m


def _choose_row_tile(m, cap, *, prefer_multi=True):
    """Largest row tile that divides M exactly (no padding, no post-kernel slice),
    a multiple of 16 (bf16 sublane packing), <= cap.  Prefer >= 2 row steps so the
    'parallel' row axis can shard across both v7x TensorCores."""
    cap = max(8, int(cap))
    for mult in (16, 8):
        divs = [t for t in range(mult, min(cap, m) + 1, mult) if m % t == 0]
        if divs:
            if prefer_multi:
                multi = [t for t in divs if m // t >= 2]
                if multi:
                    return max(multi), m
            return max(divs), m
    # Rare fallback (M not a multiple of 8): pad rows; padded rows are sliced off
    # after the kernel (costs one extra copy of the padded tail only).
    tm = min(cap, max(16, _round_up(min(m, 512), 16)))
    return tm, _round_up(m, tm)


def _choose_col_tile(cp, cap):
    """Largest multiple-of-128 divisor of Cp (Cp is already 128-aligned) <= cap."""
    best = 128
    for t in range(128, min(cap, cp) + 1, 128):
        if cp % t == 0:
            best = t
    return best


# ----------------------------------------------------------------------------
# Pallas kernel: fused (x_tile @ W_tile) + bias with lane-dense bf16 stores
# ----------------------------------------------------------------------------
def _make_expand_kernel(mxu_dtype):
    def kernel(x_ref, w_ref, b_ref, o_ref):
        # Cast the activation tile to bf16 INSIDE the kernel (VPU cast on VMEM
        # data) so the wrapper never does a separate HBM cast pass of x.
        x = x_ref[...].astype(mxu_dtype)
        acc = jnp.dot(x, w_ref[...], preferred_element_type=jnp.float32)
        # Bias add in f32, then store in the (narrow) output dtype.
        o_ref[...] = (acc + b_ref[...]).astype(o_ref.dtype)
    return kernel


def fused_expand_matmul(x_flat, w_flat, b_flat, *, out_dtype=jnp.bfloat16,
                        mxu_dtype=jnp.bfloat16, row_tile_cap=1024,
                        col_tile_cap=2048, vmem_budget=24 << 20):
    """x_flat (M, K) @ w_flat (K, Cp) + b_flat (1|Cp,) -> (M, Cp) in out_dtype.

    Cp must be a multiple of 128 (caller pads the class axis) so every store is
    an unmasked lane-dense vst."""
    M, K = x_flat.shape
    Cp = w_flat.shape[1]
    assert Cp % 128 == 0, "pad the class axis so num_class * P^3 is 128-aligned"

    x_bytes = jnp.dtype(x_flat.dtype).itemsize
    w_bytes = jnp.dtype(mxu_dtype).itemsize
    out_bytes = jnp.dtype(out_dtype).itemsize

    # Column tiling only kicks in for very large num_class * P^3 (keeps tiles
    # bounded on v5e/v7x); for typical nnFormer heads Cp <= col_tile_cap and the
    # weight stays grid-resident in a single VMEM copy.
    tn = _choose_col_tile(Cp, col_tile_cap)
    n_col = Cp // tn

    # VMEM budget: double-buffered x and out tiles + (double-buffered) weight and
    # bias tiles.  NOTE (perf-review item on weight buffering): the weight/bias
    # index maps are constant across the inner column step, so the Mosaic
    # pipeline does not re-issue their DMA per row tile; the second (idle)
    # weight buffer is simply accounted for in this budget and in
    # vmem_limit_bytes below.
    w_bufs = 2
    fixed = w_bufs * (K * tn * w_bytes + tn * 4)
    per_row = 2 * (K * x_bytes + tn * out_bytes)
    tm_cap = max(16, min(row_tile_cap, (vmem_budget - fixed) // max(per_row, 1)))
    tm, Mp = _choose_row_tile(M, tm_cap, prefer_multi=(n_col == 1))
    if Mp != M:
        x_flat = jnp.pad(x_flat, ((0, Mp - M), (0, 0)))
    n_row = Mp // tm

    need = fixed + tm * per_row
    # Explicit scoped-VMEM limit: above v5e's 16 MiB default, below v7x's 64 MiB
    # physical; v6e/v5e physical (128 MiB) is never approached.
    vmem_limit = int(min(max(need + (4 << 20), 16 << 20), 56 << 20))

    wq = w_flat.astype(mxu_dtype)                     # tiny one-time cast
    b2 = b_flat.reshape(1, Cp).astype(jnp.float32)

    x_spec = pl.BlockSpec((tm, K), lambda i, j: (i, 0))   # constant over inner j
    w_spec = pl.BlockSpec((K, tn), lambda i, j: (0, j))
    b_spec = pl.BlockSpec((1, tn), lambda i, j: (0, j))
    o_spec = pl.BlockSpec((tm, tn), lambda i, j: (i, j))  # lane-dense (tn % 128 == 0)

    out = pl.pallas_call(
        _make_expand_kernel(mxu_dtype),
        out_shape=jax.ShapeDtypeStruct((Mp, Cp), out_dtype),
        grid_spec=pltpu.PrefetchScalarGridSpec(
            num_scalar_prefetch=0,
            grid=(n_row, n_col),
            in_specs=[x_spec, w_spec, b_spec],
            out_specs=o_spec,
        ),
        compiler_params=pltpu.CompilerParams(
            dimension_semantics=("parallel", "parallel"),
            vmem_limit_bytes=vmem_limit),
    )(x_flat, wq, b2)

    if Mp != M:                                        # rare fallback path only
        out = out[:M]
    return out


# ----------------------------------------------------------------------------
# Module forward + deterministic synthetic params
# ----------------------------------------------------------------------------
def final_patch_expanding_forward(params, x, *, patch_size,
                                  out_dtype=jnp.bfloat16, mxu_dtype=jnp.bfloat16):
    """x: (N, D, H, W, dim) channels-last (as fed to the PyTorch module).
       Returns (N, num_class, D*Pd, H*Ph, W*Pw), the ConvTranspose3d output.
       Use out_dtype/mxu_dtype = jnp.float32 if bit-closer parity with the f32
       PyTorch ConvTranspose3d is required."""
    w, b = params["w"], params["b"]        # (dim, num_class, Pd, Ph, Pw), (num_class,)
    dim, num_class, Pd, Ph, Pw = w.shape
    N, D, H, W, C = x.shape
    assert C == dim and (Pd, Ph, Pw) == tuple(patch_size)
    p3 = Pd * Ph * Pw

    # Lane-dense stores without a post-kernel column-slice pass: pad the *class*
    # axis (not the flat column axis) so num_class * P^3 is a multiple of 128.
    # Padded classes have zero weight/bias and are dropped on the 8-D view right
    # before the transpose, where the slice fuses into the transpose copy.
    lane_mult = 128 // math.gcd(p3, 128)
    ncp = _round_up(num_class, lane_mult)
    if ncp != num_class:
        w = jnp.pad(w, ((0, 0), (0, ncp - num_class), (0, 0), (0, 0), (0, 0)))
        b = jnp.pad(b, ((0, ncp - num_class),))

    # Channels-last stays channels-last: the x.permute(0,4,1,2,3) of the PyTorch
    # forward is folded into the matmul view (no NCDHW ping-pong of x in HBM).
    x_flat = x.reshape(N * D * H * W, dim)
    w_flat = w.reshape(dim, ncp * p3)                   # columns = (co, kd, kh, kw)
    b_flat = jnp.repeat(b, p3)                          # bias per co, bcast over kernel

    out2 = fused_expand_matmul(x_flat, w_flat, b_flat,
                               out_dtype=out_dtype, mxu_dtype=mxu_dtype)

    # Single boundary rearrangement of the non-overlapping P^3 blocks -> NCDHW,
    # done at the narrow output dtype so its HBM traffic is halved vs f32.
    # TODO(synk): fully fusing this pixel-shuffle into the kernel requires an
    # in-VMEM lane interleave of w with kw (strided/XLU relayout of tiny minors);
    # kept as one XLA transpose here (gated-by-shape fused stores are future work).
    out = out2.reshape(N, D, H, W, ncp, Pd, Ph, Pw)
    if ncp != num_class:
        out = out[:, :, :, :, :num_class]               # fuses into the transpose
    out = out.transpose(0, 4, 1, 5, 2, 6, 3, 7)          # (N, co, D, kd, H, kh, W, kw)
    return out.reshape(N, num_class, D * Pd, H * Ph, W * Pw)


def init_params(key, dim, num_class, patch_size):
    Pd, Ph, Pw = patch_size
    kw, kb = jax.random.split(key)
    # torch ConvTranspose3d-style uniform init (fan = out_channels * kernel volume)
    bound = 1.0 / np.sqrt(num_class * Pd * Ph * Pw)
    w = jax.random.uniform(kw, (dim, num_class, Pd, Ph, Pw), jnp.float32, -bound, bound)
    b = jax.random.uniform(kb, (num_class,), jnp.float32, -bound, bound)
    return {"w": w, "b": b}


if __name__ == "__main__":
    key = jax.random.PRNGKey(0)
    kp, kx = jax.random.split(key)

    # Small shapes consistent with the module: low-res decoder feature map,
    # channels-last, expanded by patch_size back to full resolution.
    N, D, H, W = 2, 4, 4, 4
    DIM, NUM_CLASS = 32, 4
    PATCH = (4, 4, 4)

    params = init_params(kp, DIM, NUM_CLASS, PATCH)
    x = jax.random.normal(kx, (N, D, H, W, DIM), dtype=jnp.float32)

    fwd = jax.jit(lambda p, xx: final_patch_expanding_forward(p, xx, patch_size=PATCH))
    y = fwd(params, x)
    jax.block_until_ready(y)

    assert y.shape == (N, NUM_CLASS, D * PATCH[0], H * PATCH[1], W * PATCH[2]), y.shape
    assert bool(jnp.all(jnp.isfinite(y.astype(jnp.float32))))

    # Plain-JAX f32 reference of the same blockwise ConvTranspose identity.
    # (Kernel uses bf16 MXU operands and bf16 output -> loose tolerance.)
    w_flat = params["w"].reshape(DIM, -1)
    b_flat = jnp.repeat(params["b"], PATCH[0] * PATCH[1] * PATCH[2])
    ref = x.reshape(-1, DIM) @ w_flat + b_flat
    ref = ref.reshape(N, D, H, W, NUM_CLASS, *PATCH).transpose(0, 4, 1, 5, 2, 6, 3, 7)
    ref = ref.reshape(y.shape)
    y_f32 = np.asarray(jnp.asarray(y, jnp.float32))
    np.testing.assert_allclose(y_f32, np.asarray(ref), rtol=2e-2, atol=2e-2)

    print("KERNEL_OK")
</pallas_src>

<mosaic_0001>
module attributes {stable_mosaic.version = 11 : i64} {
  func.func @kernel(%arg0: i32, %arg1: i32, %arg2: memref<64x32xf32, #tpu.memory_space<vmem>>, %arg3: memref<32x256xbf16, #tpu.memory_space<vmem>>, %arg4: memref<1x256xf32, #tpu.memory_space<vmem>>, %arg5: memref<64x256xbf16, #tpu.memory_space<vmem>>) attributes {dimension_semantics = [#tpu.dimension_semantics<parallel>, #tpu.dimension_semantics<parallel>], iteration_bounds = array<i64: 2, 1>, scalar_prefetch = 0 : i64, scratch_operands = 0 : i64, tpu.core_type = #tpu.core_type<tc>, window_params = [{transform_indices = @transform_0, window_bounds = array<i64: 64, 32>}, {transform_indices = @transform_1, window_bounds = array<i64: 32, 256>}, {transform_indices = @transform_2, window_bounds = array<i64: 1, 256>}, {transform_indices = @transform_3, window_bounds = array<i64: 64, 256>}]} {
    %c0 = arith.constant 0 : index
    %c0_0 = arith.constant 0 : index
    %0 = vector.load %arg2[%c0, %c0_0] : memref<64x32xf32, #tpu.memory_space<vmem>>, vector<64x32xf32>
    %1 = arith.truncf %0 : vector<64x32xf32> to vector<64x32xbf16>
    %c0_1 = arith.constant 0 : index
    %c0_2 = arith.constant 0 : index
    %2 = vector.load %arg3[%c0_1, %c0_2] : memref<32x256xbf16, #tpu.memory_space<vmem>>, vector<32x256xbf16>
    %cst = arith.constant dense<0.000000e+00> : vector<64x256xf32>
    %3 = tpu.matmul %1, %2, %cst {dimension_numbers = #tpu.dot_dimension_numbers<[1], [0], [0], [1], [0, 0, 1, 1], [], []>} : vector<64x32xbf16>, vector<32x256xbf16>, vector<64x256xf32> -> vector<64x256xf32>
    %c0_3 = arith.constant 0 : index
    %c0_4 = arith.constant 0 : index
    %4 = vector.load %arg4[%c0_3, %c0_4] : memref<1x256xf32, #tpu.memory_space<vmem>>, vector<1x256xf32>
    %5 = vector.broadcast %4 : vector<1x256xf32> to vector<64x256xf32>
    %6 = arith.addf %3, %5 : vector<64x256xf32>
    %7 = arith.truncf %6 : vector<64x256xf32> to vector<64x256xbf16>
    %c0_5 = arith.constant 0 : index
    %c0_6 = arith.constant 0 : index
    %8 = vector.load %arg5[%c0_5, %c0_6] : memref<64x256xbf16, #tpu.memory_space<vmem>>, vector<64x256xbf16>
    tpu.vector_store %arg5[%c0_5, %c0_6], %7 {strides = array<i32>} : memref<64x256xbf16, #tpu.memory_space<vmem>>, vector<64x256xbf16>,
    return
  }
  func.func @transform_0(%arg0: i32, %arg1: i32) -> (i32, i32) {
    %c0_i32 = arith.constant 0 : i32
    %c0_i32_0 = arith.constant 0 : i32
    return %arg0, %c0_i32 : i32, i32
  }
  func.func @transform_1(%arg0: i32, %arg1: i32) -> (i32, i32) {
    %c0_i32 = arith.constant 0 : i32
    %c0_i32_0 = arith.constant 0 : i32
    return %c0_i32, %arg1 : i32, i32
  }
  func.func @transform_2(%arg0: i32, %arg1: i32) -> (i32, i32) {
    %c0_i32 = arith.constant 0 : i32
    %c0_i32_0 = arith.constant 0 : i32
    return %c0_i32, %arg1 : i32, i32
  }
  func.func @transform_3(%arg0: i32, %arg1: i32) -> (i32, i32) {
    %c0_i32 = arith.constant 0 : i32
    return %arg0, %arg1 : i32, i32
  }
}

</mosaic_0001>

<bundles_post_ra>
// kernel: _lambda_.1
= control target key start
LH: loop header
LB: loop body
LE: loop exit
PB: predicated region body
PF: predicated region fallthrough
CT: control target
= control target key end

     0   :  { %8 = vsyncpa [#allocation3], 0  ;;  %s946_s0 = inlined_call_operand.hbm [shape: f32[128,32], index: 0, kind: input, shape index: {}]   ;;  %s947_s1 = inlined_call_operand.vmem [shape: bf16[32,256], index: 1, kind: input, shape index: {}]   ;;  %s948_s2 = inlined_call_operand.vmem [shape: f32[1,256], index: 2, kind: input, shape index: {}]   ;;  %s949_s3 = inlined_call_operand.vmem [shape: bf16[128,256], index: 3, kind: output, shape index: {}]  }
   0x1   :  { %10 = vsyncpa [#allocation3 + $0x1], 0  ;;  %s788_s12 = smov 0   ;;  %s790_s13 = smov 0  }
   0x2   :  { %s792_s14 = smov 0   ;;  %s794_s15 = smov 0  }
   0x3   :  { %s796_s16 = smov 0   ;;  %s798_s17 = smov 0  }
   0x4 LB: > { %s572_s18 = sadd.s32 4294967295, %s762_s17   ;;  %s28_s19 = sadd.s32 1, %s758_s16  ;;  %s762_s17 = sphi %s798_s17, %s16_s17   ;;  %s758_s16 = sphi %s796_s16, %s957_s16   ;;  %s754_s15 = sphi %s794_s15, %s956_s15   ;;  %s750_s14 = sphi %s792_s14, %s955_s14   ;;  %s746_s13 = sphi %s790_s13, %s954_s13   ;;  %s742_s12 = sphi %s788_s12, %s953_s12  }
   0x5   : > { %p30_p0 = scmp.ge.s32.totalorder %s28_s19, 2  ;;  %s35_s20 = sadd.s32 1, %s750_s14 }
   0x6   : > { %p42_p1 = scmp.ne.s32.totalorder %s750_s14, %s746_s13  ;;  %p43_p2 = scmp.eq.s32.totalorder %s762_s17, 0 }
   0x7   : > { %s959_s19 = smov (%p30_p0, %s28_s19), 0  ;;  %p48_p4 = scmp.ne.s32.totalorder %s746_s13, %s742_s12 }
   0x8   : > { %p824_p3 = por %p43_p2, %p42_p1  ;;  %s32_s22 = ssub.s32 %s758_s16, %s959_s19 }
   0x9   : > { %p49_p5 = scmp.eq.s32.totalorder %s572_s18, 0  ;;  %p33_p6 = scmp.eq.s32.totalorder %s32_s22, 0 }
   0xa   : > { %p624_p8 = scmp.lt.s32.totalorder %s762_s17, 2  ;;  %s169_s25 = sand.u32 1, %s750_s14  }
   0xb   : > { %p831_p7 = por %p49_p5, %p48_p4  ;;  %s604_s26 = sshll.u32 %s758_s16, 10 }
   0xc   : > { %s837_s24 = scalar_select %p33_p6, %s750_s14, %s35_s20  }
   0xd   : > { %s578_s27 = sshll.u32 %s169_s25, 6  ;;  %s844_s30 = scalar_lea.hbm %s946_s0, %s604_s26 }
   0xe   : > { %s173_s4 = scalar_lea.vmem [#allocation2], %s578_s27  ;;  %p848_p9 = pnand %p624_p8, %p824_p3 }
   0xf   : > { %s180_s5 = sshll.u32 %s173_s4, 4  ;;  %s854_s7 = scalar_lea.sflag [#allocation3], %s169_s25  ;;  %s852_s5 = int_to_ptr.vmem [resolvable:$true] %s180_s5 }
  0x10   : > { %s682_s8 = scalar_lea.hbm %s844_s30, 1024  ;;  %p684_p11 = pneg %p848_p9 }
  0x11   : > { %p683_p10 = scmp.ne.s32.totalorder %s844_s30, %s682_s8  ;;  %s687_s11 = scalar_lea.hbm %s946_s0, 2048 }
  0x12   : > { %p688_p0 = scmp.lt.u32.totalorder %s844_s30, %s946_s0  ;;  %p689_p1 = scmp.lt.u32.totalorder %s687_s11, %s682_s8 }
  0x13   : > { %p685_p12 = pnand %p684_p11, %p683_p10  ;;  %p691_p3 = scmp.lt.u32.totalorder %s682_s8, %s844_s30 }
  0x14   : > { %p690_p2 = por %p689_p1, %p688_p0 }
  0x15   : > { %p686_p13 = pneg %p685_p12 }
  0x16   : > { %p692_p4 = por %p691_p3, %p690_p2 }
  0x18   : > { %p693_p5 = pnand %p692_p4, %p686_p13 }
  0x1a   : > { %696 = shalt.err (!%p693_p5)
}
  0x1b   : > { %s697_s20 = scalar_lea.vmem %s852_s5, 1024  ;;  %s764_s21 = smov [#allocation2]  }
  0x1c   : > { %p698_p6 = scmp.ne.s32.totalorder %s852_s5, %s697_s20  ;;  %s702_s22 = sshll.u32 %s764_s21, 4  ;;  %s703_s22 = int_to_ptr.vmem [resolvable:$false] %s702_s22 }
  0x1d   : > { %s704_s25 = scalar_lea.vmem %s703_s22, 2048  ;;  %p705_p12 = scmp.lt.s32.totalorder %s852_s5, %s703_s22 }
  0x1e   : > { %p700_p8 = pnand %p698_p6, %p684_p11  ;;  %p706_p0 = scmp.lt.s32.totalorder %s704_s25, %s697_s20 }
  0x20   : > { %p701_p10 = pneg %p700_p8  ;;  %p707_p1 = por %p706_p0, %p705_p12 }
  0x22   : > { %p708_p2 = pnand %p707_p1, %p701_p10 }
  0x24   : > { %711 = shalt.err (!%p708_p2)
}
  0x25   : > { %s765_s26 = smov 128   ;;  %s766_s27 = smov 8  }
  0x26   : > { %623 = dma.hbm_to_vmem [thread:$0]  (!%p848_p9), %s844_s30, 1024, %s852_s5, %s854_s7, %s765_s26, %s765_s26, %s766_s27  }
  0x27   : > { %p581_p11 = scmp.ge.s32.totalorder %s762_s17, 1  ;;  %p188_p13 = scmp.lt.s32.totalorder %s762_s17, 3 }
  0x29   : > { %p189_p3 = pnand %p581_p11, %p188_p13 }
  0x2a   : > { %s194_s28 = sand.u32 (!%p189_p3), 1, %s746_s13  }
  0x2b   : > { %192 = sbr.rel (%p189_p3) target bundleno = 289 (0x121), region = 32  ;;  %s582_s29 = sshll.u32 (!%p189_p3), %s194_s28, 6 }
  0x2c   : > { %s195_s4 = scalar_lea.sflag (!%p189_p3), [#allocation3], %s194_s28  ;;  %s885_s8 = scalar_lea.vmem (!%p189_p3), [#allocation2], %s582_s29 }
  0x32   : > { %737 = dma.done.wait (%p831_p7), %s195_s4, 1024  }
  0x33   : > { %739 = vsyncadd (%p831_p7), %s195_s4, 4294966272  ;;  %v767_v0 = vmov 0   ;;  %v676_v1 = vld [vmem:[%s947_s1 + $0x4] ss:$8 sps:$4 sm:$0xff]   ;;  %v678_v2 = vld [vmem:[%s947_s1] ss:$8 sps:$4 sm:$0xff]   ;;  %v278_v17 = vlaneseq }
  0x34   : > { %353 = vmatprep.mubr.bf16.mxu0 %v767_v0  ;;  %373 = vmatprep.mubr.bf16.mxu1 %v767_v0  ;;  %v679_v3 = vld [vmem:[%s947_s1 + $0x14] ss:$8 sps:$4 sm:$0xff]   ;;  %v681_v4 = vld [vmem:[%s947_s1 + $0x10] ss:$8 sps:$4 sm:$0xff]   ;;  %v260_v5 = vld [vmem:[%s885_s8] sm:$0xff]  ;;  %vm308_vm0 = vcmask 261120  }
  0x35   : > { %321 = vmatprep.subr.bf16.mxu0 %v676_v1  ;;  %614 = vmatprep.subr.bf16.mxu1 %v676_v1  ;;  %v261_v6 = vld [vmem:[%s885_s8 + $0x8] sm:$0xff]  ;;  %v264_v7 = vld [vmem:[%s885_s8 + $0x20] sm:$0xff]  ;;  %v262_v11 = vld [vmem:[%s885_s8 + $0x10] sm:$0xff]  ;;  %v279_v18 = vshrl.u32 %v278_v17, 7  ;;  %s583_s12 = sshll.u32 %s754_s15, 3 }
  0x36   : > { %322 = vmatpush1.bf16.msra.mxu0 %v678_v2  ;;  %616 = vmatpush1.bf16.msra.mxu1 %v678_v2  ;;  %v265_v8 = vld [vmem:[%s885_s8 + $0x28] sm:$0xff]  ;;  %v268_v9 = vpack.c.bf16 %v261_v6, %v260_v5  ;;  %v263_v12 = vld [vmem:[%s885_s8 + $0x18] sm:$0xff]  ;;  %v266_v13 = vld [vmem:[%s885_s8 + $0x30] sm:$0xff]  ;;  %p249_p7 = scmp.lt.s32.totalorder %s583_s12, 15 }
  0x37   : > { %323 = vmatprep.subr.bf16.mxu0 %v679_v3  ;;  %615 = vmatprep.subr.bf16.mxu1 %v679_v3  ;;  %v270_v10 = vpack.c.bf16 %v265_v8, %v264_v7  ;;  %v267_v14 = vld [vmem:[%s885_s8 + $0x38] sm:$0xff]  ;;  %v269_v15 = vpack.c.bf16 %v263_v12, %v262_v11  ;;  %v280_v19 = vsub.s32 0, %v279_v18  ;;  %v276_v20 = vld [vmem:[%s948_s2] sm:$0x3]  ;;  %v284_v21 = vsub.s32 1, %v279_v18 }
  0x38   : > { %v271_v16 = vpack.c.bf16 %v267_v14, %v266_v13  ;;  %s961_s12 = smov (!%p249_p7, %s583_s12), 15 }
  0x39   : > { %v281_v22 = vrot.slane %v276_v20, %v280_v19  ;;  %v285_v23 = vrot.slane %v276_v20, %v284_v21  ;;  %s605_s21 = sshll.u32 %s961_s12, 3 }
  0x3a   : > { %324 = vmatpush1.bf16.msra.mxu0 %v681_v4  ;;  %617 = vmatpush1.bf16.msra.mxu1 %v681_v4  ;;  %s918_s25 = scalar_lea.vmem %s949_s3, %s605_s21 }
  0x3d   : > { %590 = vmatmul.mubr.msk.bf16.vlgmr.msra.gmra.mrb[0].mxu0 %vm308_vm0, %v268_v9  ;;  %592 = vmatmul.mubr.msk.bf16.vlgmr.msra.gmra.mrb[0].mxu1 %vm308_vm0, %v270_v10 }
  0x3e   : > { %363 = vmatprep.mubr.bf16.mxu0 %v767_v0  ;;  %383 = vmatprep.mubr.bf16.mxu1 %v767_v0 }
  0x45   : > { %591 = vmatmul.mubr.msk.bf16.gmra.mrb[4].mxu0 %vm308_vm0, %v269_v15  ;;  %593 = vmatmul.mubr.msk.bf16.gmra.mrb[4].mxu1 %vm308_vm0, %v271_v16 }
 0x110   : > { %v355_v24 = vpop.f32.mrb[0].mxu0  ;;  %v375_v25 = vpop.f32.mrb[0].mxu1 }
 0x111   : > { %v356_v26 = vadd.f32 %v355_v24, %v281_v22  ;;  %v376_v27 = vadd.f32 %v375_v25, %v281_v22  ;;  %v357_v28 = vpop.f32.mrb[1].mxu0  ;;  %v377_v29 = vpop.f32.mrb[1].mxu1 }
 0x112   : > { %v358_v30 = vadd.f32 %v357_v28, %v285_v23  ;;  %v378_v31 = vadd.f32 %v377_v29, %v285_v23  ;;  %v359_v32 = vpop.f32.mrb[2].mxu0  ;;  %v379_v33 = vpop.f32.mrb[2].mxu1 }
 0x113   : > { %v360_v34 = vadd.f32 %v359_v32, %v281_v22  ;;  %v380_v35 = vadd.f32 %v379_v33, %v281_v22  ;;  %v361_v36 = vpop.f32.mrb[3].mxu0  ;;  %v381_v37 = vpop.f32.mrb[3].mxu1 }
 0x114   : > { %v606_v38 = vpack.c.bf16 %v358_v30, %v356_v26  ;;  %v610_v39 = vpack.c.bf16 %v378_v31, %v376_v27  ;;  %v362_v40 = vadd.f32 %v361_v36, %v285_v23  ;;  %v382_v41 = vadd.f32 %v381_v37, %v285_v23 }
 0x116   : > { %442 = vst [vmem:[%s918_s25] sm:$0xff] %v606_v38  ;;  %446 = vst [vmem:[%s918_s25 + $0x20] sm:$0xff] %v610_v39  ;;  %v607_v42 = vpack.c.bf16 %v362_v40, %v360_v34  ;;  %v611_v43 = vpack.c.bf16 %v382_v41, %v380_v35 }
 0x118   : > { %443 = vst [vmem:[%s918_s25 + $0x8] sm:$0xff] %v607_v42  ;;  %447 = vst [vmem:[%s918_s25 + $0x28] sm:$0xff] %v611_v43  ;;  %v365_v44 = vpop.f32.mrb[4].mxu0  ;;  %v385_v45 = vpop.f32.mrb[4].mxu1 }
 0x119   : > { %v366_v46 = vadd.f32 %v365_v44, %v281_v22  ;;  %v386_v47 = vadd.f32 %v385_v45, %v281_v22  ;;  %v367_v48 = vpop.f32.mrb[5].mxu0  ;;  %v387_v49 = vpop.f32.mrb[5].mxu1 }
 0x11a   : > { %v368_v50 = vadd.f32 %v367_v48, %v285_v23  ;;  %v388_v51 = vadd.f32 %v387_v49, %v285_v23  ;;  %v369_v52 = vpop.f32.mrb[6].mxu0  ;;  %v389_v53 = vpop.f32.mrb[6].mxu1 }
 0x11b   : > { %v370_v54 = vadd.f32 %v369_v52, %v281_v22  ;;  %v390_v55 = vadd.f32 %v389_v53, %v281_v22  ;;  %v371_v56 = vpop.f32.mrb[7].mxu0  ;;  %v391_v57 = vpop.f32.mrb[7].mxu1 }
 0x11c   : > { %v608_v58 = vpack.c.bf16 %v368_v50, %v366_v46  ;;  %v612_v59 = vpack.c.bf16 %v388_v51, %v386_v47  ;;  %v372_v60 = vadd.f32 %v371_v56, %v285_v23  ;;  %v392_v61 = vadd.f32 %v391_v57, %v285_v23 }
 0x11e   : > { %444 = vst [vmem:[%s918_s25 + $0x10] sm:$0xff] %v608_v58  ;;  %448 = vst [vmem:[%s918_s25 + $0x30] sm:$0xff] %v612_v59  ;;  %v609_v62 = vpack.c.bf16 %v372_v60, %v370_v54  ;;  %v613_v63 = vpack.c.bf16 %v392_v61, %v390_v55 }
 0x120   : > { %445 = vst [vmem:[%s918_s25 + $0x18] sm:$0xff] %v609_v62  ;;  %449 = vst [vmem:[%s918_s25 + $0x38] sm:$0xff] %v613_v63 }
 0x121 PF: > { %s16_s17 = sadd.s32 1, %s762_s17   ;;  %s953_s12 = smov %s746_s13 }
 0x122   : > { %p13_p9 = scmp.ge.s32.totalorder %s16_s17, 4   ;;  %s954_s13 = smov %s750_s14 }
 0x123   : > { %s955_s14 = smov %s837_s24  ;;  %s956_s15 = smov %s758_s16 }
 0x124   : > { %s957_s16 = smov %s959_s19  ;;  %15 = sbr.rel (!%p13_p9) target bundleno = 4 (0x4), region = 78 }
 0x12b   :  { %483 = vsyncpa [#allocation3], 1 }
 0x12c   :  { %485 = vsyncpa [#allocation3 + $0x1], 1 }

</bundles_post_ra>
